<compile_context>
chip_gen: v7x
topology: tpu7x:2x2x1
jax: 0.10.0
libtpu: 0.0.40
codegen_flags: <defaults>
</compile_context>

<pallas_src>
import jax
import jax.numpy as jnp
from jax.experimental import pallas as pl
from jax.experimental.pallas import tpu as pltpu


# ----------------------------------------------------------------------------
# Pallas kernel: materialize a distinct copy of the (already correctly
# laid-out) flat buffer, as K contiguous HBM->HBM slab DMAs.
# ----------------------------------------------------------------------------
def _materialize_copy_kernel(x_ref, o_ref, sem):
    # x_ref, o_ref: (K, chunk_len) arrays left in HBM (memory_space=pl.ANY).
    # One large contiguous DMA per chunk; no VMEM round-trip, no masked stores.
    k = pl.program_id(0)
    cp = pltpu.make_async_copy(x_ref.at[k], o_ref.at[k], sem)
    cp.start()
    cp.wait()


def _auto_num_chunks(total_elems, dtype, max_chunks=2, min_chunk_bytes=8 << 20):
    """Pick chunk count: up to `max_chunks` (v7x has 2 TCs), only if chunks
    divide the buffer evenly and stay >= min_chunk_bytes so per-grid-step DMA
    issue overhead is negligible.  Falls back to 1 (single contiguous DMA)."""
    itemsize = jnp.dtype(dtype).itemsize
    k = max_chunks
    while k > 1 and (
        total_elems % k != 0 or (total_elems // k) * itemsize < min_chunk_bytes
    ):
        k -= 1
    return k


def height_compression(dense_ncdhw):
    """Zero-copy HeightCompression: (N, C, D, H, W) -> (N, C*D, H, W).

    Pure metadata reshape (exactly the element order torch's .view relies on
    for a contiguous NCDHW tensor).  No HBM traffic, no kernel launch."""
    N, C, D, H, W = dense_ncdhw.shape
    return dense_ncdhw.reshape(N, C * D, H, W)


def height_compression_materialize(dense_ncdhw, num_chunks=None):
    """Same result as height_compression(), but materialized into a distinct
    output buffer via a Pallas HBM->HBM slab-DMA kernel (use only when a
    separate buffer is truly required)."""
    N, C, D, H, W = dense_ncdhw.shape
    total = N * C * D * H * W
    if num_chunks is None:
        num_chunks = _auto_num_chunks(total, dense_ncdhw.dtype)
    assert total % num_chunks == 0, "num_chunks must divide the flat buffer"
    chunk_len = total // num_chunks

    # Free metadata reshape of the contiguous buffer into K contiguous rows.
    flat = dense_ncdhw.reshape(num_chunks, chunk_len)

    out_flat = pl.pallas_call(
        _materialize_copy_kernel,
        out_shape=jax.ShapeDtypeStruct((num_chunks, chunk_len), dense_ncdhw.dtype),
        grid=(num_chunks,),
        in_specs=[pl.BlockSpec(memory_space=pl.ANY)],
        out_specs=pl.BlockSpec(memory_space=pl.ANY),
        scratch_shapes=[pltpu.SemaphoreType.DMA(())],
        # "parallel" lets v7x's two TensorCores issue their chunk DMAs
        # concurrently; measured no-op on single-TC v5e/v6e.
        compiler_params=pltpu.CompilerParams(
            dimension_semantics=("parallel",),
        ),
    )(flat)
    return out_flat.reshape(N, C * D, H, W)


# ----------------------------------------------------------------------------
# spconv .dense() glue (plain JAX scatter) + fused variant.
# ----------------------------------------------------------------------------
def sparse_to_dense(voxel_features, voxel_coords, N, C, D, H, W):
    """Glue for spconv_tensor.dense(): scatter (P, C) features at (b, z, y, x)."""
    # TODO(synk): spconv sparse-tensor .dense() is a library scatter; kept in
    # plain JAX.  With duplicate voxel coords the winning writer of .at[].set
    # is unspecified — dedupe or use .add/.max explicitly if duplicates occur.
    dense = jnp.zeros((N, C, D, H, W), dtype=voxel_features.dtype)
    b, z, y, x = (voxel_coords[:, 0], voxel_coords[:, 1],
                  voxel_coords[:, 2], voxel_coords[:, 3])
    return dense.at[b, :, z, y, x].set(voxel_features)


def sparse_to_dense_fused(voxel_features, voxel_coords, N, C, D, H, W):
    """Fused dense()+HeightCompression: scatter straight into (N, C*D, H, W).

    Skips the 5-D intermediate and any compression copy — the recommended path
    when the pipeline is built in JAX end-to-end."""
    b, z, y, x = (voxel_coords[:, 0], voxel_coords[:, 1],
                  voxel_coords[:, 2], voxel_coords[:, 3])
    fused = jnp.zeros((N, C * D, H, W), dtype=voxel_features.dtype)
    # fused channel index for voxel p, feature channel c:  c*D + z[p]
    ch = jnp.arange(C, dtype=voxel_coords.dtype)[None, :] * D + z[:, None]  # (P, C)
    return fused.at[b[:, None], ch, y[:, None], x[:, None]].set(voxel_features)


# ----------------------------------------------------------------------------
# Module forward (dict in / dict out, matching HeightCompression.forward).
# ----------------------------------------------------------------------------
def height_compression_forward(batch_dict, num_bev_features, materialize=False):
    """JAX equivalent of HeightCompression.forward on a dict.

    materialize=False (default): zero-copy metadata reshape.
    materialize=True: run the Pallas slab-DMA kernel to emit a distinct buffer.
    """
    dense = batch_dict["encoded_spconv_tensor_dense"]  # (N, C, D, H, W)
    N, C, D, H, W = dense.shape
    assert C * D == num_bev_features, "NUM_BEV_FEATURES must equal C*D"
    if materialize:
        spatial_features = height_compression_materialize(dense)
    else:
        spatial_features = height_compression(dense)
    batch_dict["spatial_features"] = spatial_features
    batch_dict["spatial_features_stride"] = batch_dict["encoded_spconv_tensor_stride"]
    return batch_dict


if __name__ == "__main__":
    key = jax.random.PRNGKey(0)

    # Small synthetic shapes: batch=2, sparse channels=4, depth=8, spatial=16x16
    N, C, D, H, W = 2, 4, 8, 16, 16
    NUM_BEV_FEATURES = C * D  # 32
    P = 64  # number of active voxels in the "sparse" tensor

    kf, kc = jax.random.split(key, 2)
    voxel_features = jax.random.normal(kf, (P, C), dtype=jnp.float32)
    # Unique voxel coordinates (avoids unspecified duplicate-scatter semantics).
    lin = jax.random.permutation(kc, N * D * H * W)[:P]
    b = lin // (D * H * W)
    z = (lin // (H * W)) % D
    y = (lin // W) % H
    x = lin % W
    voxel_coords = jnp.stack([b, z, y, x], axis=1).astype(jnp.int32)

    dense = sparse_to_dense(voxel_features, voxel_coords, N, C, D, H, W)

    # Reference: torch .view(N, C*D, H, W) on contiguous NCDHW == row-major reshape
    ref = dense.reshape(N, C * D, H, W)

    # 1) Default forward path: zero-copy metadata reshape.
    batch_dict = {
        "encoded_spconv_tensor_dense": dense,
        "encoded_spconv_tensor_stride": 8,
    }
    batch_dict = height_compression_forward(batch_dict, NUM_BEV_FEATURES)
    out_free = jax.block_until_ready(batch_dict["spatial_features"])

    # 2) Pallas materialization kernel (exercise the multi-chunk DMA path).
    out_mat = jax.block_until_ready(
        height_compression_materialize(dense, num_chunks=2)
    )

    # 3) Fused scatter directly into the (N, C*D, H, W) layout.
    fused_direct = jax.block_until_ready(
        sparse_to_dense_fused(voxel_features, voxel_coords, N, C, D, H, W)
    )

    assert out_free.shape == (N, NUM_BEV_FEATURES, H, W)
    assert out_mat.shape == (N, NUM_BEV_FEATURES, H, W)
    assert out_free.dtype == dense.dtype and out_mat.dtype == dense.dtype
    assert jnp.array_equal(out_free, ref)
    assert jnp.array_equal(out_mat, ref)
    assert jnp.array_equal(fused_direct, ref)
    assert batch_dict["spatial_features_stride"] == 8

    print("KERNEL_OK")
</pallas_src>

<mosaic_0001>
module attributes {stable_mosaic.version = 11 : i64} {
  func.func @_materialize_copy_kernel(%arg0: i32, %arg1: memref<2x8192xf32, #tpu.memory_space<any>>, %arg2: memref<2x8192xf32, #tpu.memory_space<any>>, %arg3: memref<!tpu.dma_semaphore, #tpu.memory_space<semaphore_mem>>) attributes {dimension_semantics = [#tpu.dimension_semantics<parallel>], iteration_bounds = array<i64: 2>, scalar_prefetch = 0 : i64, scratch_operands = 1 : i64, tpu.core_type = #tpu.core_type<tc>, window_params = [{}, {}]} {
    %c0_i32 = arith.constant 0 : i32
    %0 = tpu.memref_slice %arg1[%arg0, %c0_i32] : memref<2x8192xf32, #tpu.memory_space<any>> -> memref<1x8192xf32, #tpu.memory_space<any>>
    %1 = tpu.memref_squeeze %0 : memref<1x8192xf32, #tpu.memory_space<any>> -> memref<8192xf32, #tpu.memory_space<any>>
    %c0_i32_0 = arith.constant 0 : i32
    %2 = tpu.memref_slice %arg2[%arg0, %c0_i32_0] : memref<2x8192xf32, #tpu.memory_space<any>> -> memref<1x8192xf32, #tpu.memory_space<any>>
    %3 = tpu.memref_squeeze %2 : memref<1x8192xf32, #tpu.memory_space<any>> -> memref<8192xf32, #tpu.memory_space<any>>
    tpu.enqueue_dma source(%1 : memref<8192xf32, #tpu.memory_space<any>>) target(%3 : memref<8192xf32, #tpu.memory_space<any>>) target_semaphore(%arg3 : memref<!tpu.dma_semaphore, #tpu.memory_space<semaphore_mem>>)
    %c0_i32_1 = arith.constant 0 : i32
    %4 = tpu.memref_slice %arg1[%arg0, %c0_i32_1] : memref<2x8192xf32, #tpu.memory_space<any>> -> memref<1x8192xf32, #tpu.memory_space<any>>
    %5 = tpu.memref_squeeze %4 : memref<1x8192xf32, #tpu.memory_space<any>> -> memref<8192xf32, #tpu.memory_space<any>>
    %c0_i32_2 = arith.constant 0 : i32
    %6 = tpu.memref_slice %arg2[%arg0, %c0_i32_2] : memref<2x8192xf32, #tpu.memory_space<any>> -> memref<1x8192xf32, #tpu.memory_space<any>>
    %7 = tpu.memref_squeeze %6 : memref<1x8192xf32, #tpu.memory_space<any>> -> memref<8192xf32, #tpu.memory_space<any>>
    tpu.wait_dma2 semaphore(%arg3 : memref<!tpu.dma_semaphore, #tpu.memory_space<semaphore_mem>>) src(%5 : memref<8192xf32, #tpu.memory_space<any>>) dst(%7 : memref<8192xf32, #tpu.memory_space<any>>)
    return
  }
}

</mosaic_0001>

<bundles_post_ra>
// kernel: tpu_custom_call.1
= control target key start
LH: loop header
LB: loop body
LE: loop exit
PB: predicated region body
PF: predicated region fallthrough
CT: control target
= control target key end

     0   :  { %s84_s6 = smov 0   ;;  %s109_s0 = inlined_call_operand.hbm [shape: f32[2,8192], index: 0, kind: input, shape index: {}]   ;;  %s110_s1 = inlined_call_operand.hbm [shape: f32[2,8192], index: 1, kind: output, shape index: {}]  }
   0x1 LB: > { %s13_s7 = sshrl.u32 %s86_s6, 1  ;;  %s14_s8 = sand.u32 1, %s86_s6   ;;  %s86_s6 = sphi %s84_s6, %s11_s6  }
   0x2   : > { %s61_s9 = sshll.u32 %s13_s7, 7  ;;  %s88_s11 = smov 32  }
   0x3   : > { %s16_s10 = sadd.s32 %s61_s9, %s14_s8  ;;  %33 = sst [smem:[#allocation4]] %s88_s11 }
   0x4   : > { %s62_s12 = sshll.u32 %s16_s10, 4  ;;  %35 = sst [smem:[#allocation4 + $0x1]] %s88_s11 }
   0x5   : > { %s18_s15 = scalar_lea.hbm %s109_s0, %s62_s12  ;;  %s20_s18 = scalar_lea.hbm %s110_s1, %s62_s12 }
   0x6   : > { %s89_s19 = smov 1   ;;  %s90_s20 = smov [#allocation2]  }
   0x7   : > { %37 = sst [smem:[#allocation4 + $0x2]] %s89_s19  ;;  %s91_s21 = smov [#allocation3]  }
   0x8   : > { %s92_s22 = smov 0  }
   0x9   : > { %39 = dma.general %s18_s15, 1024, %s20_s18, %s90_s20, %s91_s21, [#allocation4], %s92_s22, 0  }
   0xa   : > { %82 = dma.done.wait [#allocation2], 1024 }
   0xb   : > { %83 = vsyncadd [#allocation2], 4294966272  ;;  %s11_s6 = sadd.s32 1, %s86_s6  }
   0xc   : > { %p8_p0 = scmp.ge.s32.totalorder %s11_s6, 2  }
   0xe   :  { %10 = sbr.rel (!%p8_p0) target bundleno = 1 (0x1), region = 23 }
  0x15   :  { %42 = vsyncmov [#allocation2] }
  0x18   :  { %s43_s23 = vpop.sfrf %42 }
  0x19   :  { %p64_p1 = scmp.ne.s32.totalorder %s43_s23, 0 }
  0x1b   :  { %47 = shalt.err (%p64_p1)  }

</bundles_post_ra>
